<compile_context>
chip_gen: v5e
topology: v5e:2x2
jax: 0.10.0
libtpu: 0.0.40
codegen_flags: <defaults>
</compile_context>

<pallas_src>
from functools import partial

import jax
import jax.numpy as jnp
from jax import lax
from jax.experimental import pallas as pl
from jax.experimental.pallas import tpu as pltpu

_MIN_VMEM_LIMIT = 32 * 1024 * 1024  # common scoped default; v5e default is 16 MiB


def _qkv_proj_kernel(x_ref, w_ref, q_ref, k_ref, v_ref, *, scale, d_out_p):
    """Fused Q/K/V projection for one seq block (runs once over the sequence).

    The softmax scale is folded into Q here (once per Q element, in f32 before
    the bf16 cast) so the attention inner loop carries no score rescale.
    """
    qkv = lax.dot_general(
        x_ref[...], w_ref[...],
        dimension_numbers=(((1,), (1,)), ((), ())),   # contract the d_in dims
        preferred_element_type=jnp.float32)
    q_ref[...] = (qkv[:, :d_out_p] * scale).astype(q_ref.dtype)
    k_ref[...] = qkv[:, d_out_p:2 * d_out_p].astype(k_ref.dtype)
    v_ref[...] = qkv[:, 2 * d_out_p:].astype(v_ref.dtype)


def _flash_attn_kernel(q_ref, k_ref, v_ref, o_ref, m_sc, l_sc, acc_sc):
    """One (q-block, kv-block) grid step with online softmax."""
    j = pl.program_id(1)

    @pl.when(j == 0)
    def _():
        m_sc[...] = jnp.full_like(m_sc, -jnp.inf)
        l_sc[...] = jnp.zeros_like(l_sc)
        acc_sc[...] = jnp.zeros_like(acc_sc)

    # scores = (q * scale) @ k^T  (scale already folded into q at projection).
    s = lax.dot_general(
        q_ref[...], k_ref[...],
        dimension_numbers=(((1,), (1,)), ((), ())),
        preferred_element_type=jnp.float32)

    # Online (numerically stable) softmax update, all in f32.
    m_prev = m_sc[...]
    m_new = jnp.maximum(m_prev, s.max(axis=-1, keepdims=True))
    alpha = jnp.exp(m_prev - m_new)
    p = jnp.exp(s - m_new)
    l_sc[...] = alpha * l_sc[...] + p.sum(axis=-1, keepdims=True)
    acc_sc[...] = alpha * acc_sc[...] + jnp.dot(
        p.astype(v_ref.dtype), v_ref[...], preferred_element_type=jnp.float32)
    m_sc[...] = m_new

    @pl.when(j == pl.num_programs(1) - 1)
    def _():
        inv_l = pl.reciprocal(l_sc[...], approx=True)   # EUP vrcp, ~free slot
        o_ref[...] = (acc_sc[...] * inv_l).astype(o_ref.dtype)


def _pick_block(n, target):
    """Largest block <= target that divides n (multiple of 8 if possible)."""
    if n <= target:
        return n
    for b in range(target, 7, -8):
        if n % b == 0:
            return b
    return n  # fall back to a single full-length block


def self_attention_v2(x, w_query, w_key, w_value, *,
                      block_q=None, block_kv=None, block_proj=None):
    """x: (seq, d_in); w_*: (d_out, d_in) in PyTorch nn.Linear convention."""
    seq, d_in = x.shape
    d_out = w_query.shape[0]
    scale = 1.0 / float(d_out) ** 0.5           # matches keys.shape[-1] ** 0.5

    # Lane-dense head dim: pad d_out to a multiple of 128 only if needed.
    d_out_p = ((d_out + 127) // 128) * 128
    pad = d_out_p - d_out
    if pad:
        w_query = jnp.pad(w_query, ((0, pad), (0, 0)))
        w_key = jnp.pad(w_key, ((0, pad), (0, 0)))
        w_value = jnp.pad(w_value, ((0, pad), (0, 0)))
    w_qkv = jnp.concatenate([w_query, w_key, w_value], axis=0).astype(jnp.bfloat16)
    x_bf = x.astype(jnp.bfloat16)

    out_dtype = x.dtype
    out_bytes = jnp.dtype(out_dtype).itemsize

    ts = block_proj or _pick_block(seq, 512)
    tq = block_q or _pick_block(seq, 256)
    tkv = block_kv or _pick_block(seq, 512)     # v5e: consider block_kv=128
    assert seq % ts == 0 and seq % tq == 0 and seq % tkv == 0
    nq, nkv = seq // tq, seq // tkv

    # ---------------- 1) Q/K/V projection (computed exactly once) ----------
    proj_vmem = int(1.5 * (2 * ts * d_in * 2                 # x blocks (x2 buf)
                           + 2 * 3 * d_out_p * d_in * 2      # stacked weights
                           + 3 * 2 * ts * d_out_p * 2))      # q/k/v out blocks
    proj_cost = pl.CostEstimate(
        flops=2 * seq * d_in * 3 * d_out_p,
        transcendentals=0,
        bytes_accessed=(seq * d_in * 2 + 3 * d_out_p * d_in * 2
                        + 3 * seq * d_out_p * 2))
    q, k, v = pl.pallas_call(
        partial(_qkv_proj_kernel, scale=scale, d_out_p=d_out_p),
        out_shape=[jax.ShapeDtypeStruct((seq, d_out_p), jnp.bfloat16)] * 3,
        grid_spec=pltpu.PrefetchScalarGridSpec(
            num_scalar_prefetch=0,
            grid=(seq // ts,),
            in_specs=[
                pl.BlockSpec((ts, d_in), lambda i: (i, 0)),            # x
                pl.BlockSpec((3 * d_out_p, d_in), lambda i: (0, 0)),   # [Wq;Wk;Wv]
            ],
            out_specs=[
                pl.BlockSpec((ts, d_out_p), lambda i: (i, 0)),  # Q (pre-scaled)
                pl.BlockSpec((ts, d_out_p), lambda i: (i, 0)),  # K
                pl.BlockSpec((ts, d_out_p), lambda i: (i, 0)),  # V
            ],
        ),
        compiler_params=pltpu.CompilerParams(
            dimension_semantics=("parallel",),
            vmem_limit_bytes=max(_MIN_VMEM_LIMIT, proj_vmem)),
        cost_estimate=proj_cost,
    )(x_bf, w_qkv)

    # ---------------- 2) Flash attention over the cached Q/K/V -------------
    attn_vmem = int(1.5 * (2 * tq * d_out_p * 2              # q blocks
                           + 2 * 2 * tkv * d_out_p * 2       # k + v blocks
                           + 2 * tq * d_out_p * out_bytes    # out blocks
                           + tq * d_out_p * 4 + 2 * tq * 4)) # f32 scratch
    attn_cost = pl.CostEstimate(
        flops=4 * seq * seq * d_out_p,
        transcendentals=seq * seq,
        bytes_accessed=(seq * d_out_p * 2                    # Q read once
                        + 2 * nq * seq * d_out_p * 2         # K,V re-read per q-block
                        + seq * d_out_p * out_bytes))        # output
    out = pl.pallas_call(
        _flash_attn_kernel,
        out_shape=jax.ShapeDtypeStruct((seq, d_out_p), out_dtype),
        grid_spec=pltpu.PrefetchScalarGridSpec(
            num_scalar_prefetch=0,
            grid=(nq, nkv),
            in_specs=[
                pl.BlockSpec((tq, d_out_p), lambda i, j: (i, 0)),   # Q block
                pl.BlockSpec((tkv, d_out_p), lambda i, j: (j, 0)),  # K block
                pl.BlockSpec((tkv, d_out_p), lambda i, j: (j, 0)),  # V block
            ],
            out_specs=pl.BlockSpec((tq, d_out_p), lambda i, j: (i, 0)),
            scratch_shapes=[
                pltpu.VMEM((tq, 1), jnp.float32),        # running max m
                pltpu.VMEM((tq, 1), jnp.float32),        # running denom l
                pltpu.VMEM((tq, d_out_p), jnp.float32),  # output accumulator
            ],
        ),
        compiler_params=pltpu.CompilerParams(
            dimension_semantics=("parallel", "arbitrary"),
            vmem_limit_bytes=max(_MIN_VMEM_LIMIT, attn_vmem)),
        cost_estimate=attn_cost,
    )(q, k, v)

    if pad:
        # Only when d_out is not already lane-dense; for 128-multiples the
        # padded path (and this extra HBM pass) is skipped entirely.
        out = out[:, :d_out]
    return out


def _reference(x, w_query, w_key, w_value):
    q = x @ w_query.T
    k = x @ w_key.T
    v = x @ w_value.T
    scores = q @ k.T
    w = jax.nn.softmax(scores / (k.shape[-1] ** 0.5), axis=-1)
    return w @ v


if __name__ == "__main__":
    seq, d_in, d_out = 8, 32, 32  # small shapes consistent with the module

    key = jax.random.PRNGKey(0)
    kx, kq, kk, kv = jax.random.split(key, 4)

    x = jax.random.normal(kx, (seq, d_in), dtype=jnp.float32)

    # deterministic init mimicking nn.Linear default: U(-1/sqrt(d_in), 1/sqrt(d_in))
    bound = 1.0 / (d_in ** 0.5)
    w_query = jax.random.uniform(kq, (d_out, d_in), jnp.float32, -bound, bound)
    w_key = jax.random.uniform(kk, (d_out, d_in), jnp.float32, -bound, bound)
    w_value = jax.random.uniform(kv, (d_out, d_in), jnp.float32, -bound, bound)

    out = jax.block_until_ready(self_attention_v2(x, w_query, w_key, w_value))

    ref = _reference(x, w_query, w_key, w_value)
    assert out.shape == (seq, d_out)
    # bf16 MXU operands + approx reciprocal: compare against f32 reference at a
    # correspondingly looser (but still tight) tolerance.
    assert jnp.allclose(out, ref, atol=2e-2, rtol=2e-2), float(
        jnp.max(jnp.abs(out - ref)))

    print("KERNEL_OK")
</pallas_src>

<mosaic_0001>
module attributes {stable_mosaic.version = 11 : i64} {
  func.func @_qkv_proj_kernel(%arg0: i32, %arg1: memref<8x32xbf16, #tpu.memory_space<vmem>>, %arg2: memref<384x32xbf16, #tpu.memory_space<vmem>>, %arg3: memref<8x128xbf16, #tpu.memory_space<vmem>>, %arg4: memref<8x128xbf16, #tpu.memory_space<vmem>>, %arg5: memref<8x128xbf16, #tpu.memory_space<vmem>>) attributes {dimension_semantics = [#tpu.dimension_semantics<parallel>], iteration_bounds = array<i64: 1>, scalar_prefetch = 0 : i64, scratch_operands = 0 : i64, tpu.core_type = #tpu.core_type<tc>, window_params = [{transform_indices = @transform_0, window_bounds = array<i64: 8, 32>}, {pipeline_mode = #tpu.pipeline_mode<synchronous>, transform_indices = @transform_1, window_bounds = array<i64: 384, 32>}, {transform_indices = @transform_2, window_bounds = array<i64: 8, 128>}, {transform_indices = @transform_3, window_bounds = array<i64: 8, 128>}, {transform_indices = @transform_4, window_bounds = array<i64: 8, 128>}]} {
    %c0 = arith.constant 0 : index
    %c0_0 = arith.constant 0 : index
    %0 = vector.load %arg1[%c0, %c0_0] : memref<8x32xbf16, #tpu.memory_space<vmem>>, vector<8x32xbf16>
    %c0_1 = arith.constant 0 : index
    %c0_2 = arith.constant 0 : index
    %1 = vector.load %arg2[%c0_1, %c0_2] : memref<384x32xbf16, #tpu.memory_space<vmem>>, vector<384x32xbf16>
    %cst = arith.constant dense<0.000000e+00> : vector<8x384xf32>
    %2 = tpu.matmul %0, %1, %cst {dimension_numbers = #tpu.dot_dimension_numbers<[1], [1], [0], [0], [0, 0, 1, 0], [], []>} : vector<8x32xbf16>, vector<384x32xbf16>, vector<8x384xf32> -> vector<8x384xf32>
    %3 = vector.extract_strided_slice %2 {offsets = [0, 0], sizes = [8, 128], strides = [1, 1]} : vector<8x384xf32> to vector<8x128xf32>
    %cst_3 = arith.constant 0.176776692 : f32
    %4 = vector.broadcast %cst_3 : f32 to vector<8x128xf32>
    %5 = arith.mulf %3, %4 : vector<8x128xf32>
    %6 = arith.truncf %5 : vector<8x128xf32> to vector<8x128xbf16>
    %c0_4 = arith.constant 0 : index
    %c0_5 = arith.constant 0 : index
    %7 = vector.load %arg3[%c0_4, %c0_5] : memref<8x128xbf16, #tpu.memory_space<vmem>>, vector<8x128xbf16>
    tpu.vector_store %arg3[%c0_4, %c0_5], %6 {strides = array<i32>} : memref<8x128xbf16, #tpu.memory_space<vmem>>, vector<8x128xbf16>,
    %8 = vector.extract_strided_slice %2 {offsets = [0, 128], sizes = [8, 128], strides = [1, 1]} : vector<8x384xf32> to vector<8x128xf32>
    %9 = arith.truncf %8 : vector<8x128xf32> to vector<8x128xbf16>
    %c0_6 = arith.constant 0 : index
    %c0_7 = arith.constant 0 : index
    %10 = vector.load %arg4[%c0_6, %c0_7] : memref<8x128xbf16, #tpu.memory_space<vmem>>, vector<8x128xbf16>
    tpu.vector_store %arg4[%c0_6, %c0_7], %9 {strides = array<i32>} : memref<8x128xbf16, #tpu.memory_space<vmem>>, vector<8x128xbf16>,
    %11 = vector.extract_strided_slice %2 {offsets = [0, 256], sizes = [8, 128], strides = [1, 1]} : vector<8x384xf32> to vector<8x128xf32>
    %12 = arith.truncf %11 : vector<8x128xf32> to vector<8x128xbf16>
    %c0_8 = arith.constant 0 : index
    %c0_9 = arith.constant 0 : index
    %13 = vector.load %arg5[%c0_8, %c0_9] : memref<8x128xbf16, #tpu.memory_space<vmem>>, vector<8x128xbf16>
    tpu.vector_store %arg5[%c0_8, %c0_9], %12 {strides = array<i32>} : memref<8x128xbf16, #tpu.memory_space<vmem>>, vector<8x128xbf16>,
    return
  }
  func.func @transform_0(%arg0: i32) -> (i32, i32) {
    %c0_i32 = arith.constant 0 : i32
    %c0_i32_0 = arith.constant 0 : i32
    return %arg0, %c0_i32 : i32, i32
  }
  func.func @transform_1(%arg0: i32) -> (i32, i32) {
    %c0_i32 = arith.constant 0 : i32
    %c0_i32_0 = arith.constant 0 : i32
    %c0_i32_1 = arith.constant 0 : i32
    return %c0_i32, %c0_i32_0 : i32, i32
  }
  func.func @transform_2(%arg0: i32) -> (i32, i32) {
    %c0_i32 = arith.constant 0 : i32
    %c0_i32_0 = arith.constant 0 : i32
    return %arg0, %c0_i32 : i32, i32
  }
  func.func @transform_3(%arg0: i32) -> (i32, i32) {
    %c0_i32 = arith.constant 0 : i32
    %c0_i32_0 = arith.constant 0 : i32
    return %arg0, %c0_i32 : i32, i32
  }
  func.func @transform_4(%arg0: i32) -> (i32, i32) {
    %c0_i32 = arith.constant 0 : i32
    %c0_i32_0 = arith.constant 0 : i32
    return %arg0, %c0_i32 : i32, i32
  }
}

</mosaic_0001>

<bundles_post_ra>
// kernel: tpu_custom_call.1
= control target key start
LH: loop header
LB: loop body
LE: loop exit
PB: predicated region body
PF: predicated region fallthrough
CT: control target
= control target key end

     0   :  { %10 = vsyncpa [#allocation3], 0  ;;  %vm185_vm0 = vcmask 261120   ;;  %s695_s0 = inlined_call_operand.vmem [shape: bf16[8,32], index: 0, kind: input, shape index: {}]   ;;  %s696_s1 = inlined_call_operand.vmem [shape: bf16[384,32], index: 1, kind: input, shape index: {}]   ;;  %s697_s2 = inlined_call_operand.hbm [shape: bf16[8,128], index: 2, kind: output, shape index: {0}]   ;;  %s698_s3 = inlined_call_operand.hbm [shape: bf16[8,128], index: 3, kind: output, shape index: {1}]   ;;  %s699_s4 = inlined_call_operand.hbm [shape: bf16[8,128], index: 4, kind: output, shape index: {2}]  }
   0x1   :  { %v460_v0 = vld [vmem:[%s696_s1 + $0x38] sm:$0xff]  ;;  %v459_v6 = vld [vmem:[%s696_s1 + $0x30] sm:$0xff] }
   0x2   :  { %v468_v1 = vld [vmem:[%s696_s1 + $0x78] sm:$0xff]  ;;  %v211_v3 = vsel %vm185_vm0, %v460_v0, 0  ;;  %v467_v7 = vld [vmem:[%s696_s1 + $0x70] sm:$0xff] }
   0x3   :  { %v476_v2 = vld [vmem:[%s696_s1 + $0xb8] sm:$0xff]  ;;  %v235_v4 = vsel %vm185_vm0, %v468_v1, 0  ;;  %261 = vmatpush.bf16.xpose.msra.mxu0 %v211_v3  ;;  %v475_v8 = vld [vmem:[%s696_s1 + $0xb0] sm:$0xff] }
   0x4   :  { %v259_v5 = vsel %vm185_vm0, %v476_v2, 0  ;;  %274 = vmatpush.bf16.xpose.msra.mxu1 %v235_v4 }
   0x5   :  { %287 = vmatpush.bf16.xpose.msra.mxu2 %v259_v5 }
   0x6   :  { %11 = vsyncpa [#allocation5], 0  ;;  %v208_v9 = vsel %vm185_vm0, %v459_v6, 0  ;;  %v232_v10 = vsel %vm185_vm0, %v467_v7, 0  ;;  %v256_v11 = vsel %vm185_vm0, %v475_v8, 0  ;;  %v458_v12 = vld [vmem:[%s696_s1 + $0x28] sm:$0xff] }
   0x7   :  { %v466_v13 = vld [vmem:[%s696_s1 + $0x68] sm:$0xff]  ;;  %v205_v15 = vsel %vm185_vm0, %v458_v12, 0  ;;  %v457_v18 = vld [vmem:[%s696_s1 + $0x20] sm:$0xff]  ;;  %v456_v24 = vld [vmem:[%s696_s1 + $0x18] sm:$0xff]  ;;  %s325_s16 = sshll.u32 %s698_s3, 4  ;;  %s557_s17 = smov [#allocation2]   ;;  %s326_s16 = int_to_ptr.hbm [resolvable:$true] %s325_s16 }
   0x8   :  { %v474_v14 = vld [vmem:[%s696_s1 + $0xa8] sm:$0xff]  ;;  %v229_v16 = vsel %vm185_vm0, %v466_v13, 0  ;;  %v465_v19 = vld [vmem:[%s696_s1 + $0x60] sm:$0xff]  ;;  %v202_v21 = vsel %vm185_vm0, %v457_v18, 0  ;;  %v464_v25 = vld [vmem:[%s696_s1 + $0x58] sm:$0xff]  ;;  %v199_v27 = vsel %vm185_vm0, %v456_v24, 0 }
   0x9   :  { %v253_v17 = vsel %vm185_vm0, %v474_v14, 0  ;;  %v473_v20 = vld [vmem:[%s696_s1 + $0xa0] sm:$0xff]  ;;  %v226_v22 = vsel %vm185_vm0, %v465_v19, 0  ;;  %v472_v26 = vld [vmem:[%s696_s1 + $0x98] sm:$0xff]  ;;  %v223_v28 = vsel %vm185_vm0, %v464_v25, 0  ;;  %v455_v30 = vld [vmem:[%s696_s1 + $0x10] sm:$0xff] }
   0xa   :  { %v250_v23 = vsel %vm185_vm0, %v473_v20, 0  ;;  %v247_v29 = vsel %vm185_vm0, %v472_v26, 0  ;;  %v463_v31 = vld [vmem:[%s696_s1 + $0x50] sm:$0xff]  ;;  %v196_v33 = vsel %vm185_vm0, %v455_v30, 0  ;;  %v454_v36 = vld [vmem:[%s696_s1 + $0x8] sm:$0xff]  ;;  %v453_v42 = vld [vmem:[%s696_s1] sm:$0xff] }
   0xb   :  { %262 = vmatpush.bf16.xpose.msra.mxu0 %v208_v9  ;;  %v471_v32 = vld [vmem:[%s696_s1 + $0x90] sm:$0xff]  ;;  %v220_v34 = vsel %vm185_vm0, %v463_v31, 0  ;;  %v462_v37 = vld [vmem:[%s696_s1 + $0x48] sm:$0xff]  ;;  %v193_v39 = vsel %vm185_vm0, %v454_v36, 0  ;;  %v461_v43 = vld [vmem:[%s696_s1 + $0x40] sm:$0xff]  ;;  %v190_v45 = vsel %vm185_vm0, %v453_v42, 0 }
   0xc   :  { %275 = vmatpush.bf16.xpose.msra.mxu1 %v232_v10  ;;  %v244_v35 = vsel %vm185_vm0, %v471_v32, 0  ;;  %v470_v38 = vld [vmem:[%s696_s1 + $0x88] sm:$0xff]  ;;  %v217_v40 = vsel %vm185_vm0, %v462_v37, 0  ;;  %v469_v44 = vld [vmem:[%s696_s1 + $0x80] sm:$0xff]  ;;  %v214_v46 = vsel %vm185_vm0, %v461_v43, 0  ;;  %s556_s1 = smov [#allocation4]  }
   0xd   :  { %288 = vmatpush.bf16.xpose.msra.mxu2 %v256_v11  ;;  %v241_v41 = vsel %vm185_vm0, %v470_v38, 0  ;;  %v238_v47 = vsel %vm185_vm0, %v469_v44, 0  ;;  %v16_v48 = vld [vmem:[%s695_s0] sm:$0xf]  ;;  %s323_s13 = sshll.u32 %s556_s1, 4  ;;  %s312_s18 = sshll.u32 %s557_s17, 4  ;;  %s324_s13 = int_to_ptr.vmem [resolvable:$true] %s323_s13  ;;  %s313_s18 = int_to_ptr.vmem [resolvable:$true] %s312_s18 }
   0xe   :  { %s314_s0 = sshll.u32 %s697_s2, 4  ;;  %s558_s21 = smov [#allocation6]   ;;  %s315_s0 = int_to_ptr.hbm [resolvable:$true] %s314_s0 }
   0xf   :  { %s334_s3 = sshll.u32 %s558_s21, 4  ;;  %s336_s24 = sshll.u32 %s699_s4, 4  ;;  %s335_s3 = int_to_ptr.vmem [resolvable:$true] %s334_s3  ;;  %s337_s24 = int_to_ptr.hbm [resolvable:$true] %s336_s24 }
  0x13   :  { %263 = vmatpush.bf16.xpose.msra.mxu0 %v205_v15 }
  0x14   :  { %276 = vmatpush.bf16.xpose.msra.mxu1 %v229_v16 }
  0x15   :  { %289 = vmatpush.bf16.xpose.msra.mxu2 %v253_v17 }
  0x1b   :  { %264 = vmatpush.bf16.xpose.msra.mxu0 %v202_v21 }
  0x1c   :  { %277 = vmatpush.bf16.xpose.msra.mxu1 %v226_v22 }
  0x1d   :  { %290 = vmatpush.bf16.xpose.msra.mxu2 %v250_v23 }
  0x23   :  { %265 = vmatpush.bf16.xpose.msra.mxu0 %v199_v27 }
  0x24   :  { %278 = vmatpush.bf16.xpose.msra.mxu1 %v223_v28 }
  0x25   :  { %291 = vmatpush.bf16.xpose.msra.mxu2 %v247_v29 }
  0x2b   :  { %266 = vmatpush.bf16.xpose.msra.mxu0 %v196_v33 }
  0x2c   :  { %279 = vmatpush.bf16.xpose.msra.mxu1 %v220_v34 }
  0x2d   :  { %292 = vmatpush.bf16.xpose.msra.mxu2 %v244_v35 }
  0x33   :  { %267 = vmatpush.bf16.xpose.msra.mxu0 %v193_v39 }
  0x34   :  { %280 = vmatpush.bf16.xpose.msra.mxu1 %v217_v40 }
  0x35   :  { %293 = vmatpush.bf16.xpose.msra.mxu2 %v241_v41 }
  0x3b   :  { %268 = vmatpush.bf16.xpose.msra.mxu0 %v190_v45 }
  0x3c   :  { %281 = vmatpush.bf16.xpose.msra.mxu1 %v214_v46 }
  0x3d   :  { %294 = vmatpush.bf16.xpose.msra.mxu2 %v238_v47 }
  0x42   :  { %450 = vmatmul.msk.bf16.vlgmr.msra.gmra.mxu0 %vm185_vm0, %v16_v48 }
  0x43   :  { %451 = vmatmul.msk.bf16.vlgmr.msra.gmra.mxu1 %vm185_vm0, %v16_v48 }
  0x44   :  { %452 = vmatmul.msk.bf16.vlgmr.msra.gmra.mxu2 %vm185_vm0, %v16_v48 }
  0xbf   :  { %v270_v49 = vpop.f32.mrf.mxu0 }
  0xc0   :  { %v283_v50 = vpop.f32.mrf.mxu1  ;;  %v300_v51 = vmul.f32 0.17677669, %v270_v49 }
  0xc1   :  { %v303_v52 = vpack.c.bf16 %v283_v50, %v283_v50 }
  0xc2   :  { %v301_v53 = vpack.c.bf16 %v300_v51, %v300_v51 }
  0xc3   :  { %304 = vst [vmem:[#allocation4] sm:$0xf] %v303_v52 }
  0xc4   :  { %328 = dma.vmem_to_hbm [thread:$0]  %s324_s13, 64, %s326_s16, [#allocation5]   ;;  %302 = vst [vmem:[#allocation2] sm:$0xf] %v301_v53 }
  0xc5   :  { %317 = dma.vmem_to_hbm [thread:$0]  %s313_s18, 64, %s315_s0, [#allocation3]  }
  0xc7   :  { %v296_v54 = vpop.f32.mrf.mxu2  ;;  %v272_v56 = vpop.f32.mrf.mxu0 }
  0xc8   :  { %v305_v55 = vpack.c.bf16 %v296_v54, %v296_v54  ;;  %v285_v57 = vpop.f32.mrf.mxu1 }
  0xca   :  { %306 = vst [vmem:[#allocation6] sm:$0xf] %v305_v55 }
  0xcb   :  { %339 = dma.vmem_to_hbm [thread:$0]  %s335_s3, 64, %s337_s24, [#allocation5]  }
  0xcf   :  { %v298_v58 = vpop.f32.mrf.mxu2 }
  0xd0   :  { %552 = dma.done.wait [#allocation3], 64  }
  0xd1   :  { %553 = vsyncadd [#allocation3], 4294967232 }
  0xd2   :  { %554 = dma.done.wait [#allocation5], 128  }
  0xd3   :  { %555 = vsyncadd [#allocation5], 4294967168 }
  0xd4   :  { %352 = vsyncpa [#allocation3], 1 }
  0xd5   :  { %353 = vsyncpa [#allocation5], 1 }

</bundles_post_ra>
